<compile_context>
chip_gen: v6e
topology: v6e:2x2x1
jax: 0.10.0
libtpu: 0.0.40
codegen_flags: <defaults>
</compile_context>

<pallas_src>
import functools

import jax
import jax.numpy as jnp
from jax.experimental import pallas as pl
from jax.experimental.pallas import tpu as pltpu

_EPS = 1e-8


def _sublane_pack(itemsize):
    return {1: 32, 2: 16}.get(itemsize, 8)


def _vmem_capacity_bytes():
    # 64 MiB per TensorCore on v7x, 128 MiB on v5e/v6e.
    try:
        return int(pltpu.get_tpu_info().vmem_capacity_bytes)
    except Exception:
        return 128 << 20


def _largest_divisor_leq(n, cap):
    cap = max(1, min(n, int(cap)))
    for d in range(cap, 0, -1):
        if n % d == 0:
            return d
    return 1


def _pick_channel_tile(C, bytes_per_chan, budget, itemsize):
    """Budget-bounded channel tile. Returns (tc, divides)."""
    if C * bytes_per_chan <= budget:
        return C, True
    sub = _sublane_pack(itemsize)
    max_tc = max(sub, (budget // max(bytes_per_chan, 1)) // sub * sub)
    if C % sub == 0:
        best = sub
        tc = sub
        while tc <= min(C, max_tc):
            if C % tc == 0:
                best = tc
            tc += sub
        return best, True
    tc = int(min(max_tc, ((C + sub - 1) // sub) * sub))
    if tc >= C:
        # TODO(synk): HW tiling would be needed if even a single channel row
        # exceeds the budget; return full C (minimal legal choice) for now.
        return C, True
    return tc, False  # non-dividing: cdiv grid + masked edge block


def _moments_std(xf, inv_hw):
    # Two-pass moments over the lane (HW) axis; matches torch reference.
    mean = jnp.sum(xf, axis=-1, keepdims=True) * inv_hw
    d = xf - mean
    var = jnp.sum(d * d, axis=-1, keepdims=True) * inv_hw
    return jnp.sqrt(var + _EPS)  # (..., 1)


def _stddev_concat_kernel(x_ref, o_ref, *, inv_hw):
    # x_ref: (TB, TC, HW) ; o_ref: (TB, 2, TC, HW)
    x = x_ref[...]
    std = _moments_std(x.astype(jnp.float32), inv_hw)                 # (TB, TC, 1)
    o_ref[:, 0:1] = x[:, None].astype(o_ref.dtype)                    # pass-through half
    std_b = jnp.broadcast_to(std, x.shape).astype(o_ref.dtype)        # lane broadcast
    o_ref[:, 1:2] = std_b[:, None]


def _stddev_collapse_fused_kernel(x_ref, o_ref, *, inv_hw, inv_c, c):
    # x_ref: (TB, C, HW) ; o_ref: (TB, C+1, HW)  -- fully fused concat
    x = x_ref[...]
    std = _moments_std(x.astype(jnp.float32), inv_hw)                 # (TB, C, 1)
    mstd = jnp.sum(std, axis=-2, keepdims=True) * inv_c               # (TB, 1, 1)
    o_ref[:, :c] = x.astype(o_ref.dtype)
    o_ref[:, c:] = jnp.broadcast_to(
        mstd, (x.shape[0], 1, x.shape[2])).astype(o_ref.dtype)


def _stddev_collapse_kernel(x_ref, o_ref, acc_ref, *, inv_hw, inv_c, hw, c, tc,
                            mask_edge):
    # Fallback for huge per-batch slabs.
    # x_ref: (1, TC, HW) ; o_ref: (1, 1, HW) ; acc_ref: (1, 1) f32 scratch
    ci = pl.program_id(1)

    @pl.when(ci == 0)
    def _():
        acc_ref[...] = jnp.zeros_like(acc_ref)

    std = _moments_std(x_ref[0].astype(jnp.float32), inv_hw)          # (TC, 1)
    if mask_edge:
        rows = jax.lax.broadcasted_iota(jnp.int32, (tc, 1), 0)
        std = jnp.where(ci * tc + rows < c, std, 0.0)
    acc_ref[...] += jnp.sum(std, axis=0, keepdims=True)

    @pl.when(ci == pl.num_programs(1) - 1)
    def _():
        v = acc_ref[...] * inv_c                                      # (1, 1)
        o_ref[...] = jnp.broadcast_to(v[None], (1, 1, hw)).astype(o_ref.dtype)


def spatial_stddev(x, collapse=False, channel_tile=None,
                   force_collapse_fallback=False):
    if x.ndim != 4:
        # TODO(synk): 5-D input path (reduce over last 3 dims) not implemented.
        raise NotImplementedError("only the 4-D NCHW path is implemented")
    N, C, H, W = x.shape
    HW = H * W
    itemsize = jnp.dtype(x.dtype).itemsize
    sub = _sublane_pack(itemsize)
    inv_hw = 1.0 / HW

    cap = _vmem_capacity_bytes()
    budget = (3 * cap) // 8        # double-buffered block budget (24 / 48 MiB)
    vmem_cap = (3 * cap) // 4      # vmem_limit_bytes ceiling (48 / 96 MiB)

    x2 = x.reshape(N, C, HW)       # HW becomes the lane dim

    if not collapse:
        bytes_per_chan = 2 * 3 * HW * itemsize   # dbl-buffered in + 2x out rows
        if channel_tile is not None:
            tc = int(channel_tile)
            assert tc == C or tc % sub == 0, (
                "channel_tile must be C or a multiple of the sublane pack")
        else:
            tc, _ = _pick_channel_tile(C, bytes_per_chan, budget, itemsize)
        nc = int(pl.cdiv(C, tc))

        per_batch = 3 * tc * HW * itemsize
        tb = _largest_divisor_leq(N, budget // (2 * per_batch))
        if nc * (N // tb) < 2 and N >= 2:        # keep >=2 grid pts for megacore
            tb = _largest_divisor_leq(N, N // 2)
        nb = N // tb

        block_bytes = 2 * tb * per_batch
        vmem_limit = int(min(max(32 << 20, block_bytes + (4 << 20)), vmem_cap))

        out = pl.pallas_call(
            functools.partial(_stddev_concat_kernel, inv_hw=inv_hw),
            out_shape=jax.ShapeDtypeStruct((N, 2, C, HW), x.dtype),
            grid=(nb, nc),
            in_specs=[pl.BlockSpec((tb, tc, HW), lambda b, c: (b, c, 0))],
            out_specs=pl.BlockSpec((tb, 2, tc, HW), lambda b, c: (b, 0, c, 0)),
            compiler_params=pltpu.CompilerParams(
                dimension_semantics=("parallel", "parallel"),
                vmem_limit_bytes=vmem_limit),
            cost_estimate=pl.CostEstimate(
                flops=6 * N * C * HW, transcendentals=N * C,
                bytes_accessed=3 * N * C * HW * itemsize),
        )(x2)
        # (N, 2, C, HW) -> (N, 2C, H, W): channel order matches torch.cat.
        return out.reshape(N, 2 * C, H, W)

    # ---- collapse=True ----
    fused_per_batch = (2 * C + 1) * HW * itemsize   # in (C) + out (C+1) rows
    if (channel_tile is None and not force_collapse_fallback
            and 2 * fused_per_batch <= budget):
        tb = _largest_divisor_leq(N, budget // (2 * fused_per_batch))
        if (N // tb) < 2 and N >= 2:
            tb = _largest_divisor_leq(N, N // 2)
        nb = N // tb
        vmem_limit = int(min(max(32 << 20, 2 * tb * fused_per_batch + (4 << 20)),
                             vmem_cap))
        out = pl.pallas_call(
            functools.partial(_stddev_collapse_fused_kernel,
                              inv_hw=inv_hw, inv_c=1.0 / C, c=C),
            out_shape=jax.ShapeDtypeStruct((N, C + 1, HW), x.dtype),
            grid=(nb,),
            in_specs=[pl.BlockSpec((tb, C, HW), lambda b: (b, 0, 0))],
            out_specs=pl.BlockSpec((tb, C + 1, HW), lambda b: (b, 0, 0)),
            compiler_params=pltpu.CompilerParams(
                dimension_semantics=("parallel",),
                vmem_limit_bytes=vmem_limit),
            cost_estimate=pl.CostEstimate(
                flops=7 * N * C * HW, transcendentals=N * C,
                bytes_accessed=(2 * C + 1) * N * HW * itemsize),
        )(x2)
        return out.reshape(N, C + 1, H, W)

    # Fallback: per-batch slab too large for a single block.  Channel tiles are
    # reduced into a VMEM accumulator; the pass-through concat is done by XLA.
    # TODO(synk): fuse the pass-through concat for this huge-slab path too.
    bytes_per_chan = 2 * HW * itemsize              # collapse path: tiny out block
    if channel_tile is not None:
        tc = int(channel_tile)
        assert tc == C or tc % sub == 0, (
            "channel_tile must be C or a multiple of the sublane pack")
    else:
        tc, _ = _pick_channel_tile(C, bytes_per_chan, budget, itemsize)
    nc = int(pl.cdiv(C, tc))
    mask_edge = (C % tc != 0)

    block_bytes = 2 * (tc + 1) * HW * itemsize
    vmem_limit = int(min(max(32 << 20, block_bytes + (4 << 20)), vmem_cap))
    stdch = pl.pallas_call(
        functools.partial(_stddev_collapse_kernel, inv_hw=inv_hw, inv_c=1.0 / C,
                          hw=HW, c=C, tc=tc, mask_edge=mask_edge),
        out_shape=jax.ShapeDtypeStruct((N, 1, HW), x.dtype),
        grid=(N, nc),
        in_specs=[pl.BlockSpec((1, tc, HW), lambda n, c: (n, c, 0))],
        out_specs=pl.BlockSpec((1, 1, HW), lambda n, c: (n, 0, 0)),
        scratch_shapes=[pltpu.VMEM((1, 1), jnp.float32)],
        compiler_params=pltpu.CompilerParams(
            dimension_semantics=("parallel", "arbitrary"),
            vmem_limit_bytes=vmem_limit),
        cost_estimate=pl.CostEstimate(
            flops=5 * N * C * HW, transcendentals=N * C,
            bytes_accessed=(N * C * HW + N * HW) * itemsize),
    )(x2)
    return jnp.concatenate([x2, stdch], axis=1).reshape(N, C + 1, H, W)


def _reference(x, collapse=False):
    # Pure-JAX reference mirroring the PyTorch forward.
    mean = jnp.mean(x, axis=(-1, -2), keepdims=True)
    vals = jnp.sqrt(jnp.mean((x - mean) ** 2, axis=(-1, -2), keepdims=True) + 1e-8)
    if collapse:
        vals = jnp.mean(vals, axis=1, keepdims=True)
        vals = jnp.broadcast_to(vals, x[:, :1].shape)
    else:
        vals = jnp.broadcast_to(vals, x.shape)
    return jnp.concatenate([x, vals], axis=1)


if __name__ == "__main__":
    key = jax.random.PRNGKey(0)
    k1, k2, k3 = jax.random.split(key, 3)

    # module-spec shape (N=2, C=4, 16x16): full-C fused paths
    x = jax.random.normal(k1, (2, 4, 16, 16), dtype=jnp.float32)
    out = jax.block_until_ready(spatial_stddev(x, collapse=False))
    assert out.shape == (2, 8, 16, 16)
    assert jnp.allclose(out, _reference(x, collapse=False), atol=1e-4, rtol=1e-4)

    out_c = jax.block_until_ready(spatial_stddev(x, collapse=True))
    assert out_c.shape == (2, 5, 16, 16)
    assert jnp.allclose(out_c, _reference(x, collapse=True), atol=1e-4, rtol=1e-4)

    # channel-tiled non-collapse path (TC=8 -> channel grid of 2)
    xb = jax.random.normal(k2, (2, 16, 16, 16), dtype=jnp.float32)
    out_t = jax.block_until_ready(spatial_stddev(xb, collapse=False, channel_tile=8))
    assert out_t.shape == (2, 32, 16, 16)
    assert jnp.allclose(out_t, _reference(xb, collapse=False), atol=1e-4, rtol=1e-4)

    # collapse fallback (channel-tile accumulator) path
    out_tc = jax.block_until_ready(
        spatial_stddev(xb, collapse=True, channel_tile=8, force_collapse_fallback=True))
    assert out_tc.shape == (2, 17, 16, 16)
    assert jnp.allclose(out_tc, _reference(xb, collapse=True), atol=1e-4, rtol=1e-4)

    # non-dividing channel tile (C=12, tile=8): masked edge-block paths
    xc = jax.random.normal(k3, (2, 12, 16, 16), dtype=jnp.float32)
    out_e = jax.block_until_ready(spatial_stddev(xc, collapse=False, channel_tile=8))
    assert out_e.shape == (2, 24, 16, 16)
    assert jnp.allclose(out_e, _reference(xc, collapse=False), atol=1e-4, rtol=1e-4)

    out_ec = jax.block_until_ready(
        spatial_stddev(xc, collapse=True, channel_tile=8, force_collapse_fallback=True))
    assert out_ec.shape == (2, 13, 16, 16)
    assert jnp.allclose(out_ec, _reference(xc, collapse=True), atol=1e-4, rtol=1e-4)

    print("KERNEL_OK")
</pallas_src>

<mosaic_0001>
module attributes {stable_mosaic.version = 11 : i64} {
  func.func @_stddev_concat_kernel(%arg0: i32, %arg1: i32, %arg2: memref<1x4x256xf32, #tpu.memory_space<vmem>>, %arg3: memref<1x2x4x256xf32, #tpu.memory_space<vmem>>) attributes {dimension_semantics = [#tpu.dimension_semantics<parallel>, #tpu.dimension_semantics<parallel>], iteration_bounds = array<i64: 2, 1>, scalar_prefetch = 0 : i64, scratch_operands = 0 : i64, tpu.core_type = #tpu.core_type<tc>, window_params = [{transform_indices = @transform_0, window_bounds = array<i64: 1, 4, 256>}, {transform_indices = @transform_1, window_bounds = array<i64: 1, 2, 4, 256>}]} {
    %c0 = arith.constant 0 : index
    %c0_0 = arith.constant 0 : index
    %c0_1 = arith.constant 0 : index
    %0 = vector.load %arg2[%c0, %c0_0, %c0_1] : memref<1x4x256xf32, #tpu.memory_space<vmem>>, vector<1x4x256xf32>
    %cst = arith.constant dense<0.000000e+00> : vector<1x4xf32>
    %1 = vector.multi_reduction <add>, %0, %cst [2] : vector<1x4x256xf32> to vector<1x4xf32>
    %2 = vector.shape_cast %1 : vector<1x4xf32> to vector<1x4x1xf32>
    %cst_2 = arith.constant 3.906250e-03 : f32
    %3 = vector.broadcast %cst_2 : f32 to vector<1x4x1xf32>
    %4 = arith.mulf %2, %3 : vector<1x4x1xf32>
    %5 = vector.broadcast %4 : vector<1x4x1xf32> to vector<1x4x256xf32>
    %6 = arith.subf %0, %5 : vector<1x4x256xf32>
    %7 = arith.mulf %6, %6 : vector<1x4x256xf32>
    %cst_3 = arith.constant dense<0.000000e+00> : vector<1x4xf32>
    %8 = vector.multi_reduction <add>, %7, %cst_3 [2] : vector<1x4x256xf32> to vector<1x4xf32>
    %9 = vector.shape_cast %8 : vector<1x4xf32> to vector<1x4x1xf32>
    %cst_4 = arith.constant 3.906250e-03 : f32
    %10 = vector.broadcast %cst_4 : f32 to vector<1x4x1xf32>
    %11 = arith.mulf %9, %10 : vector<1x4x1xf32>
    %cst_5 = arith.constant 9.99999993E-9 : f32
    %12 = vector.broadcast %cst_5 : f32 to vector<1x4x1xf32>
    %13 = arith.addf %11, %12 : vector<1x4x1xf32>
    %14 = math.sqrt %13 : vector<1x4x1xf32>
    %15 = vector.shape_cast %0 : vector<1x4x256xf32> to vector<1x1x4x256xf32>
    %c0_6 = arith.constant 0 : index
    %c0_7 = arith.constant 0 : index
    %c0_8 = arith.constant 0 : index
    %c0_9 = arith.constant 0 : index
    %16 = vector.load %arg3[%c0_6, %c0_7, %c0_8, %c0_9] : memref<1x2x4x256xf32, #tpu.memory_space<vmem>>, vector<1x1x4x256xf32>
    tpu.vector_store %arg3[%c0_6, %c0_7, %c0_8, %c0_9], %15 {strides = array<i32>} : memref<1x2x4x256xf32, #tpu.memory_space<vmem>>, vector<1x1x4x256xf32>,
    %17 = vector.shape_cast %14 : vector<1x4x1xf32> to vector<1x4x1xf32>
    %18 = vector.broadcast %17 : vector<1x4x1xf32> to vector<1x4x256xf32>
    %19 = vector.shape_cast %18 : vector<1x4x256xf32> to vector<1x1x4x256xf32>
    %c0_10 = arith.constant 0 : index
    %c1 = arith.constant 1 : index
    %c0_11 = arith.constant 0 : index
    %c0_12 = arith.constant 0 : index
    %20 = vector.load %arg3[%c0_10, %c1, %c0_11, %c0_12] : memref<1x2x4x256xf32, #tpu.memory_space<vmem>>, vector<1x1x4x256xf32>
    tpu.vector_store %arg3[%c0_10, %c1, %c0_11, %c0_12], %19 {strides = array<i32>} : memref<1x2x4x256xf32, #tpu.memory_space<vmem>>, vector<1x1x4x256xf32>,
    return
  }
  func.func @transform_0(%arg0: i32, %arg1: i32) -> (i32, i32, i32) {
    %c0_i32 = arith.constant 0 : i32
    %c0_i32_0 = arith.constant 0 : i32
    return %arg0, %arg1, %c0_i32 : i32, i32, i32
  }
  func.func @transform_1(%arg0: i32, %arg1: i32) -> (i32, i32, i32, i32) {
    %c0_i32 = arith.constant 0 : i32
    %c0_i32_0 = arith.constant 0 : i32
    %c0_i32_1 = arith.constant 0 : i32
    return %arg0, %c0_i32, %arg1, %c0_i32_0 : i32, i32, i32, i32
  }
}

</mosaic_0001>

<bundles_post_ra>
// kernel: tpu_custom_call.1
= control target key start
LH: loop header
LB: loop body
LE: loop exit
PB: predicated region body
PF: predicated region fallthrough
CT: control target
= control target key end

     0   :  { %6 = vsyncpa [#allocation3], 0  ;;  %s674_s0 = inlined_call_operand.hbm [shape: f32[2,4,256], index: 0, kind: input, shape index: {}]   ;;  %s675_s1 = inlined_call_operand.hbm [shape: f32[2,2,4,256], index: 1, kind: output, shape index: {}]  }
   0x1   :  { %8 = vsyncpa [#allocation3 + $0x1], 0 }
   0x2   :  { %9 = vsyncpa [#allocation4], 0 }
   0x3   :  { %11 = vsyncpa [#allocation4 + $0x1], 0  ;;  %s516_s6 = smov 0   ;;  %s518_s7 = smov 0  }
   0x4   :  { %s520_s8 = smov 0   ;;  %s522_s9 = smov 0  }
   0x5   :  { %s524_s10 = smov 0   ;;  %s526_s11 = smov 0  }
   0x6 LB: > { %s305_s12 = sadd.s32 4294967295, %s499_s11   ;;  %s306_s13 = sadd.s32 4294967294, %s499_s11   ;;  %s499_s11 = sphi %s526_s11, %s17_s11   ;;  %s495_s10 = sphi %s524_s10, %s687_s10   ;;  %s491_s9 = sphi %s522_s9, %s686_s9   ;;  %s487_s8 = sphi %s520_s8, %s685_s8   ;;  %s483_s7 = sphi %s518_s7, %s684_s7   ;;  %s479_s6 = sphi %s516_s6, %s683_s6  }
   0x7   : > { %s29_s14 = sadd.s32 1, %s495_s10  ;;  %s38_s15 = sadd.s32 1, %s487_s8 }
   0x8   : > { %p31_p0 = scmp.ge.s32.totalorder %s29_s14, 2  ;;  %p45_p1 = scmp.ne.s32.totalorder %s487_s8, %s483_s7 }
   0x9   : > { %p46_p2 = scmp.eq.s32.totalorder %s499_s11, 0  ;;  %p51_p3 = scmp.ne.s32.totalorder %s483_s7, %s479_s6 }
   0xa   : > { %s689_s14 = smov (%p31_p0, %s29_s14), 0  ;;  %p52_p5 = scmp.eq.s32.totalorder %s305_s12, 0 }
   0xb   : > { %p557_p4 = por %p46_p2, %p45_p1  ;;  %s33_s17 = ssub.s32 %s495_s10, %s689_s14 }
   0xc   : > { %p77_p6 = scmp.eq.s32.totalorder %s305_s12, 1  ;;  %p36_p7 = scmp.eq.s32.totalorder %s33_s17, 0 }
   0xd   : > { %p563_p8 = por %p52_p5, %p51_p3  ;;  %p83_p10 = scmp.eq.s32.totalorder %s306_s13, 1 }
   0xe   : > { %p567_p9 = por %p77_p6, %p45_p1  ;;  %p335_p13 = scmp.lt.s32.totalorder %s499_s11, 2 }
   0xf   : > { %s572_s20 = scalar_select %p36_p7, %s487_s8, %s38_s15  }
  0x10   : > { %p574_p11 = por %p83_p10, %p51_p3  ;;  %s103_s22 = sand.u32 1, %s487_s8  }
  0x11   : > { %s309_s23 = sshll.u32 %s103_s22, 3  ;;  %s321_s24 = sshll.u32 %s495_s10, 7 }
  0x12   : > { %s679_s21 = scalar_select %p574_p11, 1, 0 }
  0x13   : > { %s115_s27 = scalar_lea.hbm %s674_s0, %s321_s24  ;;  %s107_s28 = scalar_lea.vmem [#allocation2], %s309_s23 }
  0x14   : > { %s117_s29 = sshll.u32 %s107_s28, 4  ;;  %p587_p0 = pnand %p335_p13, %p557_p4  ;;  %s118_s29 = int_to_ptr.vmem [resolvable:$true] %s117_s29 }
  0x15   : > { %p312_p1 = scmp.ge.s32.totalorder %s499_s11, 1  ;;  %p122_p2 = scmp.lt.s32.totalorder %s499_s11, 3 }
  0x16   : > { %s104_s2 = scalar_lea.sflag [#allocation3], %s103_s22  ;;  %p393_p3 = pneg %p587_p0 }
  0x17   : > { %s404_s3 = scalar_lea.vmem %s118_s29, 128  ;;  %s501_s4 = smov [#allocation2]  }
  0x18   : > { %p405_p5 = scmp.ne.s32.totalorder %s118_s29, %s404_s3  ;;  %s409_s5 = sshll.u32 %s501_s4, 4  ;;  %s410_s5 = int_to_ptr.vmem [resolvable:$false] %s409_s5 }
  0x19   : > { %s411_s12 = scalar_lea.vmem %s410_s5, 256  ;;  %p412_p10 = scmp.lt.s32.totalorder %s118_s29, %s410_s5 }
  0x1a   : > { %p407_p6 = pnand %p405_p5, %p393_p3  ;;  %p413_p12 = scmp.lt.s32.totalorder %s411_s12, %s404_s3 }
  0x1c   : > { %p408_p7 = pneg %p407_p6  ;;  %p414_p4 = por %p413_p12, %p412_p10 }
  0x1e   : > { %p415_p13 = pnand %p414_p4, %p408_p7 }
  0x20   : > { %418 = shalt.err (!%p415_p13)
}
  0x21   : > { %330 = dma.hbm_to_vmem [thread:$0]  (!%p587_p0), %s115_s27, 128, %s118_s29, %s104_s2  }
  0x22   : > { %p123_p11 = pnand %p312_p1, %p122_p2 }
  0x23   : > { %s602_s13 = sand.u32 (!%p123_p11), 1, %s483_s7  }
  0x24   : > { %126 = sbr.rel (%p123_p11) target bundleno = 375 (0x177), region = 24  ;;  %s313_s15 = sshll.u32 (!%p123_p11), %s602_s13, 3 }
  0x25   : > { %s129_s16 = scalar_lea.sflag (!%p123_p11), [#allocation3], %s602_s13  ;;  %s132_s17 = scalar_lea.vmem (!%p123_p11), [#allocation2], %s313_s15 }
  0x29   : > { %470 = dma.done.wait (%p563_p8), %s129_s16, 128  }
  0x2a   : > { %472 = vsyncadd (%p563_p8), %s129_s16, 4294967168  ;;  %s314_s22 = sshll.u32 %s602_s13, 4  ;;  %vm155_vm0 = vcmask 1043456   ;;  %v151_v0 = vld [vmem:[%s132_s17] sm:$0xff]  ;;  %v502_v5 = vmov 839922192   ;;  %v166_v7 = vlaneseq }
  0x2b   : > { %s611_s23 = scalar_lea.vmem [#allocation5], %s314_s22  ;;  %v153_v1 = vcombine.high %v151_v0, %v151_v0  ;;  %v156_v2 = vsel %vm155_vm0, %v151_v0, 0.0  ;;  %v164_v6 = vunpack.c.l.s4 %v502_v5  ;;  %s322_s24 = sshll.u32 %s491_s9, 8 }
  0x2c   : > { %190 = vst [vmem:[%s611_s23] sm:$0xff] %v151_v0  ;;  %v167_v9 = vshrl.u32 %v166_v7, 7  ;;  %s218_s18 = sshll.u32 %s611_s23, 4  ;;  %s625_s27 = scalar_lea.hbm %s675_s1, %s322_s24  ;;  %s620_s18 = int_to_ptr.vmem [resolvable:$true] %s218_s18 }
  0x2d   : > { %v157_v3 = vsel %vm155_vm0, %v153_v1, 0.0  ;;  %v165_v8 = vunpack.c.0.s8 %v164_v6  ;;  %s203_s28 = scalar_lea.sflag [#allocation4], %s602_s13  ;;  %s419_s29 = scalar_lea.vmem %s620_s18, 256 }
  0x2e   : > { %v158_v4 = vadd.f32 %v157_v3, %v156_v2  ;;  %p420_p8 = scmp.ne.s32.totalorder %s620_s18, %s419_s29  ;;  %s503_s9 = smov [#allocation5]  }
  0x2f   : > { %v168_v10 = vsub.s32 %v165_v8, %v167_v9  ;;  %s423_s30 = sshll.u32 %s503_s9, 4  ;;  %s424_s30 = int_to_ptr.vmem [resolvable:$false] %s423_s30 }
  0x30   : > { %159 = vadd.xlane.f32.xlu0 %v158_v4  ;;  %p421_p11 = pnand %p420_p8, %p567_p9  ;;  %s425_s2 = scalar_lea.vmem %s424_s30, 512 }
  0x31   : > { %p426_p0 = scmp.lt.s32.totalorder %s620_s18, %s424_s30  ;;  %p427_p1 = scmp.lt.s32.totalorder %s425_s2, %s419_s29 }
  0x32   : > { %p422_p12 = pneg %p421_p11 }
  0x33   : > { %p428_p2 = por %p427_p1, %p426_p0 }
  0x35   : > { %p429_p3 = pnand %p428_p2, %p422_p12 }
  0xb9   : > { %v160_v11 = vpop.xlane.xlu0 %159 }
  0xba   : > { %v161_v12 = vmul.f32 0.00390625, %v160_v11 }
  0xbc   : > { %v169_v13 = vrot.slane %v161_v12, %v168_v10 }
  0xbe   : > { %v171_v14 = vsub.f32 %v151_v0, %v169_v13 }
  0xc0   : > { %v172_v15 = vmul.f32 %v171_v14, %v171_v14 }
  0xc2   : > { %v174_v16 = vcombine.high %v172_v15, %v172_v15  ;;  %v176_v17 = vsel %vm155_vm0, %v172_v15, 0.0 }
  0xc4   : > { %v177_v18 = vsel %vm155_vm0, %v174_v16, 0.0 }
  0xc5   : > { %v178_v19 = vadd.f32 %v177_v18, %v176_v17 }
  0xc7   : > { %179 = vadd.xlane.f32.xlu0 %v178_v19 }
 0x150   : > { %v180_v20 = vpop.xlane.xlu0 %179 }
 0x151   : > { %v181_v21 = vmul.f32 0.00390625, %v180_v20 }
 0x153   : > { %v182_v22 = vadd.f32 1e-08, %v181_v21 }
 0x155   : > { %389 = vrsqrt.f32 %v182_v22  ;;  %vm185_vm1 = vcmp.eq.f32.partialorder %v182_v22, inf  ;;  %v188_v25 = vand.u32 2147483648, %v182_v22  ;;  %vm187_vm2 = vcmp.eq.f32.partialorder %v182_v22, 0.0 }
 0x162   : > { %v390_v23 = vpop.eup %389 }
 0x163   : > { %v184_v24 = vmul.f32 %v390_v23, %v182_v22 }
 0x165   : > { %v186_v26 = vsel %vm185_vm1, %v182_v22, %v184_v24 }
 0x166   : > { %v189_v27 = vsel %vm187_vm2, %v188_v25, %v186_v26 }
 0x167   : > { %v198_v28 = vrot.slane %v189_v27, %v168_v10 }
 0x169   : > { %315 = vst [vmem:[%s611_s23 + $0x8] sm:$0xff] %v198_v28 }
 0x16a   : > { %432 = shalt.err (!%p429_p3)
}
 0x16b   : > { %s433_s3 = scalar_lea.hbm %s625_s27, 256  ;;  %s437_s12 = scalar_lea.hbm %s675_s1, 512 }
 0x16c   : > { %p434_p5 = scmp.ne.s32.totalorder %s625_s27, %s433_s3  ;;  %p438_p10 = scmp.lt.s32.totalorder %s625_s27, %s675_s1 }
 0x16d   : > { %p439_p4 = scmp.lt.s32.totalorder %s437_s12, %s433_s3 }
 0x16e   : > { %p435_p6 = pnand %p434_p5, %p567_p9 }
 0x16f   : > { %p440_p13 = por %p439_p4, %p438_p10 }
 0x170   : > { %p436_p7 = pneg %p435_p6 }
 0x172   : > { %p441_p8 = pnand %p440_p13, %p436_p7 }
 0x174   : > { %444 = shalt.err (!%p441_p8)
}
 0x175   : > { %s504_s17 = smov 128   ;;  %s505_s22 = smov 8  }
 0x176   : > { %325 = dma.vmem_to_hbm [thread:$0]  (%p567_p9), %s620_s18, 256, %s625_s27, %s203_s28, %s504_s17, %s504_s17, %s505_s22  }
 0x177 PF: > { %s233_s23 = sand.u32 1, %s479_s6   ;;  %p681_p11 = scmp.ne.s32.totalorder %s679_s21, 0 }
 0x178   : > { %p682_p12 = scmp.ge.s32.totalorder %s499_s11, 2  ;;  %s234_s24 = scalar_lea.sflag [#allocation4], %s233_s23 }
 0x17a   : > { %p332_p0 = pnand %p682_p12, %p681_p11 }
 0x17c   : > { %p333_p1 = pneg %p332_p0 }
 0x17e   : > { %474 = dma.done.wait (%p333_p1), %s234_s24, 256  }
 0x17f   : > { %476 = vsyncadd (%p333_p1), %s234_s24, 4294967040  ;;  %s17_s11 = sadd.s32 1, %s499_s11   ;;  %s683_s6 = smov %s483_s7 }
 0x180   : > { %p14_p2 = scmp.ge.s32.totalorder %s17_s11, 4   ;;  %s684_s7 = smov %s487_s8 }
 0x181   : > { %s685_s8 = smov %s572_s20  ;;  %s686_s9 = smov %s495_s10 }
 0x182   : > { %s687_s10 = smov %s689_s14  ;;  %16 = sbr.rel (!%p14_p2) target bundleno = 6 (0x6), region = 70 }
 0x187   :  { %239 = vsyncpa [#allocation3], 1 }
 0x188   :  { %241 = vsyncpa [#allocation3 + $0x1], 1 }
 0x189   :  { %242 = vsyncpa [#allocation4], 1 }
 0x18a   :  { %244 = vsyncpa [#allocation4 + $0x1], 1 }

</bundles_post_ra>
